<compile_context>
chip_gen: v6e
topology: v6e:2x2x1
jax: 0.10.0
libtpu: 0.0.40
codegen_flags: <defaults>
</compile_context>

<pallas_src>
import functools

import jax
import jax.numpy as jnp
from jax import lax
from jax.experimental import pallas as pl
from jax.experimental.pallas import tpu as pltpu

TEMPERATURE = 0.5
EPS = 1e-8            # torch.nn.functional.cosine_similarity default eps
_OUT_LANES = 128      # lane-dense output tile width (unmasked vst)

_ROW_TILES = (512, 256, 128, 64, 32, 16, 8)
_COL_TILES = (2048, 1024, 512, 256, 128, 64, 32, 16, 8)


def _ntxent_kernel(q_ref, k_ref, p_ref, out_ref, l_ref, *, inv_t):
    """One (row_tile x col_tile) block of the streaming NT-Xent forward."""
    i = pl.program_id(0)                  # row-tile index   ("parallel")
    j = pl.program_id(1)                  # col-tile index   ("arbitrary", last)
    nj = pl.num_programs(1)
    tr = q_ref.shape[0]
    tc = k_ref.shape[0]

    @pl.when(j == 0)
    def _init():
        l_ref[...] = jnp.zeros(l_ref.shape, l_ref.dtype)

    q = q_ref[...]                        # (tr, D) rows, already * inv_norm / sqrt(T)
    k = k_ref[...]                        # (tc, D) columns, same scaling

    # scores[r, c] = cos(row r, col c) / temperature.
    # Transpose-free: contract the last (lane) dim of both operands on the MXU.
    s = lax.dot_general(q, k, (((1,), (1,)), ((), ())),
                        preferred_element_type=jnp.float32)        # (tr, tc)

    # Static-shift log-sum-exp: every score is bounded by 1/T (cosine in
    # [-1, 1] scaled by 1/T), so exp(s - 1/T) never overflows and the online
    # running max (XLU lane-max + alpha rescale + second scratch) is dropped.
    # TODO(synk): for temperatures << 0.5 every off-diagonal term can underflow
    # to 0 under a static shift; re-enable an online max in that regime.
    e = jnp.exp(s - inv_t)                                          # (tr, tc)
    l_new = l_ref[...] + jnp.sum(e, axis=-1, keepdims=True)
    l_ref[...] = l_new

    # Exact self-similarity (diagonal) removal, gated: only the column tile(s)
    # that actually contain this row tile's diagonal pay the iota/select/
    # reduce; every other column step skips this block entirely.
    @pl.when((i * tr < (j + 1) * tc) & (j * tc < (i + 1) * tr))
    def _drop_diag():
        row_g = i * tr + lax.broadcasted_iota(jnp.int32, (tr, tc), 0)
        col_g = j * tc + lax.broadcasted_iota(jnp.int32, (tr, tc), 1)
        diag = jnp.sum(jnp.where(row_g == col_g, e, 0.0),
                       axis=-1, keepdims=True)
        l_ref[...] = l_new - diag

    @pl.when(j == nj - 1)
    def _finalize():
        lse = inv_t + jnp.log(l_ref[...])                           # (tr, 1)
        # Positive-pair score: paired-row dot product with the partner block
        # (row r pairs with row (r + B) mod N of the stacked representation).
        qf = q.astype(jnp.float32)
        pos = jnp.sum(qf * p_ref[...].astype(jnp.float32), axis=-1, keepdims=True)
        out_ref[...] = jnp.broadcast_to(lse - pos, out_ref.shape)   # lane-dense store


def _vmem_capacity_bytes():
    """Physical VMEM of the local chip; conservative fallback (v7x per-TC)."""
    try:
        cap = getattr(pltpu.get_tpu_info(), "vmem_capacity_bytes", None)
        if cap:
            return int(cap)
    except Exception:
        pass
    return 64 * 1024 * 1024


def _vmem_estimate(row_tile, col_tile, d, in_bytes):
    """Rough per-step VMEM footprint (double-buffered inputs + intermediates)."""
    inputs = 2 * (2 * row_tile + col_tile) * d * in_bytes   # q + partner + col blocks
    outputs = 2 * row_tile * _OUT_LANES * 4
    interm = 3 * row_tile * col_tile * 4                    # s, exp(s), slack
    return inputs + outputs + interm + row_tile * 4


def nt_xent_loss(zis, zjs, *, temperature=TEMPERATURE, matmul_dtype=jnp.bfloat16,
                 row_tile=None, col_tile=None, vmem_limit_bytes=None):
    """NT-Xent loss matching NTXentLoss.forward (cosine similarity, temp=0.5)."""
    if zis.ndim != 2 or zis.shape != zjs.shape:
        raise ValueError("zis / zjs must both be (batch, dim)")
    B, D = zis.shape
    N = 2 * B
    in_bytes = jnp.dtype(matmul_dtype).itemsize

    vmem_cap = _vmem_capacity_bytes()
    budget = int(vmem_cap * 0.6)          # leave headroom for compiler scratch

    # Tile candidates: largest first (row_tile is the primary HBM-traffic knob:
    # the column operand is re-streamed N/row_tile times).  row_tile must
    # divide B so the partner block offset is whole tiles; that also
    # guarantees grid[0] = N/row_tile >= 2, so both v7x TensorCores get work.
    row_cands = [int(row_tile)] if row_tile is not None else \
        [t for t in _ROW_TILES if B % t == 0]
    col_cands = [int(col_tile)] if col_tile is not None else \
        [t for t in _COL_TILES if N % t == 0]
    row_cands = [t for t in row_cands if t > 0 and B % t == 0 and t % 8 == 0]
    col_cands = [t for t in col_cands if t > 0 and N % t == 0 and t % 8 == 0]
    if not row_cands or not col_cands:
        # TODO(synk): pad odd batch sizes with masked rows instead of bailing
        # (also keeps MXU-friendly 256-multiple tiles for awkward batch sizes).
        raise NotImplementedError("nt_xent_loss requires batch size divisible by 8")

    pick = None
    for rt in row_cands:
        for ct in col_cands:
            if _vmem_estimate(rt, ct, D, in_bytes) <= budget:
                pick = (rt, ct)
                break
        if pick is not None:
            break
    if pick is None:                      # nothing fits the estimate: smallest legal tiles
        pick = (row_cands[-1], col_cands[-1])
    row_tile, col_tile = pick

    # Normalize rows once (O(N*D)) and fold 1/sqrt(T) into both operands so the
    # MXU output is already cos/T.  The per-row clamp at sqrt(EPS) stands in for
    # PyTorch's max(||x||*||y||, eps) product clamp (identical away from
    # near-zero-norm embeddings).  Plain concat instead of the interleaving
    # stack+reshape (row order does not change the loss).  Cast once to the
    # (default bf16) MXU operand dtype; all LSE math stays f32 in-kernel.
    rep = jnp.concatenate([zjs, zis], axis=0).astype(jnp.float32)      # (N, D)
    inv_norm = lax.rsqrt(jnp.maximum(jnp.sum(rep * rep, axis=-1, keepdims=True), EPS))
    rep_s = (rep * (inv_norm / jnp.sqrt(jnp.float32(temperature)))).astype(matmul_dtype)

    n_row_blocks = N // row_tile
    partner_off = B // row_tile           # partner rows live +/- B rows away
    grid = (n_row_blocks, N // col_tile)

    cp = dict(dimension_semantics=("parallel", "arbitrary"))
    if vmem_limit_bytes is not None:
        cp["vmem_limit_bytes"] = int(vmem_limit_bytes)
    elif _vmem_estimate(row_tile, col_tile, D, in_bytes) > 12 * 1024 * 1024:
        # Raise the scoped-VMEM cap (16 MiB default on v5e, 32 MiB on v6e/v7x)
        # so the large, HBM-efficient tiles compile; stay under physical VMEM.
        cp["vmem_limit_bytes"] = int(vmem_cap * 0.85)

    kernel = functools.partial(_ntxent_kernel, inv_t=float(1.0 / temperature))

    per_row = pl.pallas_call(
        kernel,
        out_shape=jax.ShapeDtypeStruct((N, _OUT_LANES), jnp.float32),
        grid_spec=pltpu.PrefetchScalarGridSpec(
            num_scalar_prefetch=0,
            grid=grid,
            in_specs=[
                pl.BlockSpec((row_tile, D), lambda i, j: (i, 0)),          # row block
                pl.BlockSpec((col_tile, D), lambda i, j: (j, 0)),          # col block
                pl.BlockSpec((row_tile, D),                                # partner block
                             lambda i, j: ((i + partner_off) % n_row_blocks, 0)),
            ],
            out_specs=pl.BlockSpec((row_tile, _OUT_LANES), lambda i, j: (i, 0)),
            scratch_shapes=[pltpu.VMEM((row_tile, 1), jnp.float32)],       # running sum
        ),
        compiler_params=pltpu.CompilerParams(**cp),
    )(rep_s, rep_s, rep_s)

    return jnp.mean(per_row[:, 0])


def _reference_loss(zis, zjs, temperature=TEMPERATURE):
    """Pure-JAX mirror of the PyTorch module, for a sanity check."""
    d = zis.shape[-1]
    rep = jnp.stack([zjs, zis], axis=1).reshape(-1, d).astype(jnp.float32)
    n = rep.shape[0]
    norms = jnp.sqrt(jnp.sum(rep * rep, axis=-1, keepdims=True))
    score = (rep @ rep.T) / jnp.maximum(norms * norms.T, EPS) / temperature
    score = jnp.where(jnp.eye(n, dtype=bool), -jnp.inf, score)
    target = jnp.arange(n) ^ 1
    lse = jax.scipy.special.logsumexp(score, axis=-1)
    return jnp.mean(lse - score[jnp.arange(n), target])


if __name__ == "__main__":
    key = jax.random.PRNGKey(0)
    k1, k2, k3, k4 = jax.random.split(key, 4)

    # Small shapes implied by the module's forward: (batch, feature_dim).
    B, D = 8, 32
    zis = jax.random.normal(k1, (B, D), dtype=jnp.float32)
    zjs = jax.random.normal(k2, (B, D), dtype=jnp.float32)

    loss = nt_xent_loss(zis, zjs)                       # default bf16 MXU operands
    jax.block_until_ready(loss)
    ref = _reference_loss(zis, zjs)
    assert jnp.allclose(loss, ref, atol=5e-2, rtol=5e-2), (loss, ref)

    # Multi-tile path: several column steps (streamed accumulation + gated
    # exact diagonal removal) and several row tiles (partner indexing).
    B2, D2 = 16, 32
    zis2 = jax.random.normal(k3, (B2, D2), dtype=jnp.float32)
    zjs2 = jax.random.normal(k4, (B2, D2), dtype=jnp.float32)
    ref2 = _reference_loss(zis2, zjs2)

    loss2 = nt_xent_loss(zis2, zjs2, row_tile=8, col_tile=8)
    jax.block_until_ready(loss2)
    assert jnp.allclose(loss2, ref2, atol=5e-2, rtol=5e-2), (loss2, ref2)

    # f32 MXU-operand path (tighter tolerance; MXU default-precision passes).
    loss3 = nt_xent_loss(zis2, zjs2, matmul_dtype=jnp.float32,
                         row_tile=8, col_tile=8)
    jax.block_until_ready(loss3)
    assert jnp.allclose(loss3, ref2, atol=2e-2, rtol=2e-2), (loss3, ref2)

    print("KERNEL_OK")
</pallas_src>

<mosaic_0001>
module attributes {stable_mosaic.version = 11 : i64} {
  func.func @_ntxent_kernel(%arg0: i32, %arg1: i32, %arg2: memref<8x32xbf16, #tpu.memory_space<vmem>>, %arg3: memref<16x32xbf16, #tpu.memory_space<vmem>>, %arg4: memref<8x32xbf16, #tpu.memory_space<vmem>>, %arg5: memref<8x128xf32, #tpu.memory_space<vmem>>, %arg6: memref<8x1xf32, #tpu.memory_space<vmem>>) attributes {dimension_semantics = [#tpu.dimension_semantics<parallel>, #tpu.dimension_semantics<arbitrary>], iteration_bounds = array<i64: 2, 1>, scalar_prefetch = 0 : i64, scratch_operands = 1 : i64, tpu.core_type = #tpu.core_type<tc>, window_params = [{transform_indices = @transform_0, window_bounds = array<i64: 8, 32>}, {transform_indices = @transform_1, window_bounds = array<i64: 16, 32>}, {transform_indices = @transform_2, window_bounds = array<i64: 8, 32>}, {transform_indices = @transform_3, window_bounds = array<i64: 8, 128>}]} {
    %c0_i32 = arith.constant 0 : i32
    %0 = arith.cmpi eq, %arg1, %c0_i32 : i32
    %1 = arith.extui %0 : i1 to i32
    %c0_i32_0 = arith.constant 0 : i32
    %2 = arith.cmpi ne, %1, %c0_i32_0 : i32
    scf.if %2 {
      %cst_16 = arith.constant 0.000000e+00 : f32
      %28 = vector.broadcast %cst_16 : f32 to vector<8x1xf32>
      %c0_17 = arith.constant 0 : index
      %c0_18 = arith.constant 0 : index
      %29 = vector.load %arg6[%c0_17, %c0_18] : memref<8x1xf32, #tpu.memory_space<vmem>>, vector<8x1xf32>
      tpu.vector_store %arg6[%c0_17, %c0_18], %28 {strides = array<i32>} : memref<8x1xf32, #tpu.memory_space<vmem>>, vector<8x1xf32>,
    } else {
    }
    %c0 = arith.constant 0 : index
    %c0_1 = arith.constant 0 : index
    %3 = vector.load %arg2[%c0, %c0_1] : memref<8x32xbf16, #tpu.memory_space<vmem>>, vector<8x32xbf16>
    %c0_2 = arith.constant 0 : index
    %c0_3 = arith.constant 0 : index
    %4 = vector.load %arg3[%c0_2, %c0_3] : memref<16x32xbf16, #tpu.memory_space<vmem>>, vector<16x32xbf16>
    %cst = arith.constant dense<0.000000e+00> : vector<8x16xf32>
    %5 = tpu.matmul %3, %4, %cst {dimension_numbers = #tpu.dot_dimension_numbers<[1], [1], [0], [0], [0, 0, 1, 0], [], []>} : vector<8x32xbf16>, vector<16x32xbf16>, vector<8x16xf32> -> vector<8x16xf32>
    %cst_4 = arith.constant 2.000000e+00 : f32
    %6 = vector.broadcast %cst_4 : f32 to vector<8x16xf32>
    %7 = arith.subf %5, %6 : vector<8x16xf32>
    %8 = math.exp %7 : vector<8x16xf32>
    %c0_5 = arith.constant 0 : index
    %c0_6 = arith.constant 0 : index
    %9 = vector.load %arg6[%c0_5, %c0_6] : memref<8x1xf32, #tpu.memory_space<vmem>>, vector<8x1xf32>
    %cst_7 = arith.constant dense<0.000000e+00> : vector<8xf32>
    %10 = vector.multi_reduction <add>, %8, %cst_7 [1] : vector<8x16xf32> to vector<8xf32>
    %11 = vector.shape_cast %10 : vector<8xf32> to vector<8x1xf32>
    %12 = arith.addf %9, %11 : vector<8x1xf32>
    %c0_8 = arith.constant 0 : index
    %c0_9 = arith.constant 0 : index
    %13 = vector.load %arg6[%c0_8, %c0_9] : memref<8x1xf32, #tpu.memory_space<vmem>>, vector<8x1xf32>
    tpu.vector_store %arg6[%c0_8, %c0_9], %12 {strides = array<i32>} : memref<8x1xf32, #tpu.memory_space<vmem>>, vector<8x1xf32>,
    %c8_i32 = arith.constant 8 : i32
    %14 = arith.muli %arg0, %c8_i32 : i32
    %c1_i32 = arith.constant 1 : i32
    %15 = arith.addi %arg1, %c1_i32 : i32
    %c16_i32 = arith.constant 16 : i32
    %16 = arith.muli %15, %c16_i32 : i32
    %17 = arith.cmpi slt, %14, %16 : i32
    %c16_i32_10 = arith.constant 16 : i32
    %18 = arith.muli %arg1, %c16_i32_10 : i32
    %c1_i32_11 = arith.constant 1 : i32
    %19 = arith.addi %arg0, %c1_i32_11 : i32
    %c8_i32_12 = arith.constant 8 : i32
    %20 = arith.muli %19, %c8_i32_12 : i32
    %21 = arith.cmpi slt, %18, %20 : i32
    %22 = arith.andi %17, %21 : i1
    %23 = arith.extui %22 : i1 to i32
    %c0_i32_13 = arith.constant 0 : i32
    %24 = arith.cmpi ne, %23, %c0_i32_13 : i32
    scf.if %24 {
      %c8_i32_16 = arith.constant 8 : i32
      %28 = arith.muli %arg0, %c8_i32_16 : i32
      %29 = tpu.iota {dimensions = array<i32: 0>} : vector<8x16xi32>
      %30 = vector.broadcast %28 : i32 to vector<8x16xi32>
      %31 = arith.addi %30, %29 : vector<8x16xi32>
      %c16_i32_17 = arith.constant 16 : i32
      %32 = arith.muli %arg1, %c16_i32_17 : i32
      %33 = tpu.iota {dimensions = array<i32: 1>} : vector<8x16xi32>
      %34 = vector.broadcast %32 : i32 to vector<8x16xi32>
      %35 = arith.addi %34, %33 : vector<8x16xi32>
      %36 = arith.cmpi eq, %31, %35 : vector<8x16xi32>
      %cst_18 = arith.constant 0.000000e+00 : f32
      %37 = vector.broadcast %cst_18 : f32 to vector<8x16xf32>
      %38 = arith.select %36, %8, %37 : vector<8x16xi1>, vector<8x16xf32>
      %cst_19 = arith.constant dense<0.000000e+00> : vector<8xf32>
      %39 = vector.multi_reduction <add>, %38, %cst_19 [1] : vector<8x16xf32> to vector<8xf32>
      %40 = vector.shape_cast %39 : vector<8xf32> to vector<8x1xf32>
      %41 = arith.subf %12, %40 : vector<8x1xf32>
      %c0_20 = arith.constant 0 : index
      %c0_21 = arith.constant 0 : index
      %42 = vector.load %arg6[%c0_20, %c0_21] : memref<8x1xf32, #tpu.memory_space<vmem>>, vector<8x1xf32>
      tpu.vector_store %arg6[%c0_20, %c0_21], %41 {strides = array<i32>} : memref<8x1xf32, #tpu.memory_space<vmem>>, vector<8x1xf32>,
    } else {
    }
    %c0_i32_14 = arith.constant 0 : i32
    %25 = arith.cmpi eq, %arg1, %c0_i32_14 : i32
    %26 = arith.extui %25 : i1 to i32
    %c0_i32_15 = arith.constant 0 : i32
    %27 = arith.cmpi ne, %26, %c0_i32_15 : i32
    scf.if %27 {
      %c0_16 = arith.constant 0 : index
      %c0_17 = arith.constant 0 : index
      %28 = vector.load %arg6[%c0_16, %c0_17] : memref<8x1xf32, #tpu.memory_space<vmem>>, vector<8x1xf32>
      %29 = math.log %28 : vector<8x1xf32>
      %cst_18 = arith.constant 2.000000e+00 : f32
      %30 = vector.broadcast %cst_18 : f32 to vector<8x1xf32>
      %31 = arith.addf %30, %29 : vector<8x1xf32>
      %32 = arith.extf %3 : vector<8x32xbf16> to vector<8x32xf32>
      %c0_19 = arith.constant 0 : index
      %c0_20 = arith.constant 0 : index
      %33 = vector.load %arg4[%c0_19, %c0_20] : memref<8x32xbf16, #tpu.memory_space<vmem>>, vector<8x32xbf16>
      %34 = arith.extf %33 : vector<8x32xbf16> to vector<8x32xf32>
      %35 = arith.mulf %32, %34 : vector<8x32xf32>
      %cst_21 = arith.constant dense<0.000000e+00> : vector<8xf32>
      %36 = vector.multi_reduction <add>, %35, %cst_21 [1] : vector<8x32xf32> to vector<8xf32>
      %37 = vector.shape_cast %36 : vector<8xf32> to vector<8x1xf32>
      %38 = arith.subf %31, %37 : vector<8x1xf32>
      %39 = vector.shape_cast %38 : vector<8x1xf32> to vector<8x1xf32>
      %40 = vector.broadcast %39 : vector<8x1xf32> to vector<8x128xf32>
      %c0_22 = arith.constant 0 : index
      %c0_23 = arith.constant 0 : index
      %41 = vector.load %arg5[%c0_22, %c0_23] : memref<8x128xf32, #tpu.memory_space<vmem>>, vector<8x128xf32>
      tpu.vector_store %arg5[%c0_22, %c0_23], %40 {strides = array<i32>} : memref<8x128xf32, #tpu.memory_space<vmem>>, vector<8x128xf32>,
    } else {
    }
    return
  }
  func.func @transform_0(%arg0: i32, %arg1: i32) -> (i32, i32) {
    %c0_i32 = arith.constant 0 : i32
    %c0_i32_0 = arith.constant 0 : i32
    return %arg0, %c0_i32 : i32, i32
  }
  func.func @transform_1(%arg0: i32, %arg1: i32) -> (i32, i32) {
    %c0_i32 = arith.constant 0 : i32
    %c0_i32_0 = arith.constant 0 : i32
    return %arg1, %c0_i32 : i32, i32
  }
  func.func @transform_2(%arg0: i32, %arg1: i32) -> (i32, i32) {
    %c1_i32 = arith.constant 1 : i32
    %0 = arith.addi %arg0, %c1_i32 : i32
    %c2_i32 = arith.constant 2 : i32
    %c0_i32 = arith.constant 0 : i32
    %1 = arith.cmpi eq, %c2_i32, %c0_i32 : i32
    %c1_i32_0 = arith.constant 1 : i32
    %2 = arith.select %1, %c1_i32_0, %c2_i32 : i32
    %3 = arith.remsi %0, %2 : i32
    %c0_i32_1 = arith.constant 0 : i32
    %4 = arith.cmpi ne, %3, %c0_i32_1 : i32
    %c0_i32_2 = arith.constant 0 : i32
    %5 = arith.cmpi slt, %3, %c0_i32_2 : i32
    %c0_i32_3 = arith.constant 0 : i32
    %6 = arith.cmpi slt, %2, %c0_i32_3 : i32
    %7 = arith.xori %5, %6 : i1
    %8 = arith.andi %7, %4 : i1
    %9 = arith.addi %3, %2 : i32
    %10 = arith.select %8, %9, %3 : i32
    %c0_i32_4 = arith.constant 0 : i32
    %c0_i32_5 = arith.constant 0 : i32
    return %10, %c0_i32_4 : i32, i32
  }
  func.func @transform_3(%arg0: i32, %arg1: i32) -> (i32, i32) {
    %c0_i32 = arith.constant 0 : i32
    %c0_i32_0 = arith.constant 0 : i32
    return %arg0, %c0_i32 : i32, i32
  }
}

</mosaic_0001>

<bundles_post_ra>
// kernel: tpu_custom_call.1
= control target key start
LH: loop header
LB: loop body
LE: loop exit
PB: predicated region body
PF: predicated region fallthrough
CT: control target
= control target key end

     0   :  { %s1223_s0 = inlined_call_operand.hbm [shape: bf16[16,32], index: 0, kind: input, shape index: {}]   ;;  %s1224_s1 = inlined_call_operand.hbm [shape: bf16[16,32], index: 1, kind: input, shape index: {}]   ;;  %s1225_s2 = inlined_call_operand.hbm [shape: bf16[16,32], index: 2, kind: input, shape index: {}]   ;;  %s1226_s3 = inlined_call_operand.hbm [shape: f32[16,128], index: 3, kind: output, shape index: {}]  }
   0x1   :  { %1236 = sst [smem:[#allocation16_spill]] %s1223_s0 }
   0x2   :  { %1237 = sst [smem:[#allocation17_spill]] %s1224_s1 }
   0x3   :  { %8 = vsyncpa [#allocation4], 0 }
   0x4   :  { %10 = vsyncpa [#allocation4 + $0x1], 0 }
   0x5   :  { %11 = vsyncpa [#allocation7], 0 }
   0x6   :  { %12 = vsyncpa [#allocation5], 0 }
   0x7   :  { %14 = vsyncpa [#allocation5 + $0x1], 0  ;;  %s934_s12 = smov 0   ;;  %s936_s13 = smov 0  }
   0x8   :  { %s938_s14 = smov 0   ;;  %s940_s15 = smov 0  }
   0x9   :  { %s942_s16 = smov 0   ;;  %s944_s17 = smov 0  }
   0xa   :  { %s946_s18 = smov 0   ;;  %s948_s19 = smov 0  }
   0xb   :  { %s950_s20 = smov 0  }
   0xc LB: > { %1238 = sst [smem:[#allocation14_spill]] %s899_s19  ;;  %s980_s21 = sadd.s32 4294967295, %s903_s20   ;;  %s903_s20 = sphi %s950_s20, %s20_s20   ;;  %s899_s19 = sphi %s948_s19, %s1262_s19   ;;  %s895_s18 = sphi %s946_s18, %s1261_s18   ;;  %s891_s17 = sphi %s944_s17, %s1268_s17   ;;  %s887_s16 = sphi %s942_s16, %s1267_s16   ;;  %s883_s15 = sphi %s940_s15, %s1266_s15   ;;  %s879_s14 = sphi %s938_s14, %s1265_s14   ;;  %s875_s13 = sphi %s936_s13, %s1264_s13   ;;  %s871_s12 = sphi %s934_s12, %s1263_s12  }
   0xd   : > { %s554_s22 = sadd.s32 4294967294, %s903_s20   ;;  %s32_s23 = sadd.s32 1, %s899_s19 }
   0xe   : > { %s39_s24 = sadd.s32 1, %s891_s17  ;;  %p34_p0 = scmp.ge.s32.totalorder %s32_s23, 2 }
   0xf   : > { %p46_p1 = scmp.ne.s32.totalorder %s891_s17, %s887_s16  ;;  %p1229_p2 = scmp.eq.s32.totalorder %s903_s20, 0 }
  0x10   : > { %p52_p3 = scmp.ne.s32.totalorder %s887_s16, %s883_s15  ;;  %s90_s28 = ssub.s32 0, %s32_s23 }
  0x11   : > { %s990_s25 = scalar_select %p34_p0, 0, %s32_s23  }
  0x12   : > { %p997_p4 = por %p1229_p2, %p46_p1  ;;  %s1003_s29 = smin.u32 %s90_s28, %s32_s23 }
  0x13   : > { %1239 = sst [smem:[#allocation15_spill]] %s990_s25  ;;  %s36_s27 = ssub.s32 %s899_s19, %s990_s25 }
  0x14   : > { %p37_p5 = scmp.eq.s32.totalorder %s36_s27, 0  ;;  %s101_s30 = sadd.s32 1, %s990_s25 }
  0x15   : > { %p154_p6 = scmp.eq.s32.totalorder %s980_s21, 1  ;;  %s103_s5 = ssub.s32 0, %s101_s30 }
  0x16   : > { %s1008_s4 = scalar_select %p37_p5, %s891_s17, %s39_s24  }
  0x17   : > { %s558_s6 = smin.u32 %s103_s5, %s101_s30  ;;  %p1013_p7 = por %p154_p6, %p46_p1 }
  0x18   : > { %s1017_s8 = sand.u32 1, %s558_s6   ;;  %p160_p8 = scmp.eq.s32.totalorder %s554_s22, 1 }
  0x19   : > { %s1241_s7 = scalar_select %p1013_p7, 1, 0 }
  0x1a   : > { %p1022_p9 = por %p160_p8, %p52_p3  ;;  %p1228_p11 = scmp.lt.s32.totalorder %s903_s20, 2 }
  0x1b   : > { %s196_s10 = sand.u32 1, %s903_s20   ;;  %s198_s11 = sand.u32 1, %s891_s17  }
  0x1c   : > { %s1242_s9 = scalar_select %p1022_p9, 1, 0 }
  0x1d   : > { %s564_s23 = sshll.u32 %s198_s11, 2  ;;  %s565_s24 = sshll.u32 %s899_s19, 6 }
  0x1e   : > { %s1243_s0 = sld [smem:[#allocation16_spill]]  ;;  %s200_s5 = scalar_lea.vmem [#allocation3], %s564_s23 }
  0x1f   : > { %s207_s25 = sshll.u32 %s200_s5, 4  ;;  %p1038_p12 = pnand %p1228_p11, %p997_p4  ;;  %s208_s25 = int_to_ptr.vmem [resolvable:$true] %s207_s25 }
  0x20   : > { %s1042_s6 = scalar_lea.sflag [#allocation4], %s196_s10  ;;  %s722_s11 = scalar_lea.vmem %s208_s25, 64 }
  0x21   : > { %p711_p13 = pneg %p1038_p12  ;;  %p723_p0 = scmp.ne.s32.totalorder %s208_s25, %s722_s11 }
  0x22   : > { %s905_s27 = smov [#allocation3]  }
  0x23   : > { %p725_p1 = pnand %p723_p0, %p711_p13 }
  0x24   : > { %s205_s30 = scalar_lea.hbm %s1243_s0, %s565_s24  ;;  %s727_s24 = sshll.u32 %s905_s27, 4  ;;  %s728_s24 = int_to_ptr.vmem [resolvable:$false] %s727_s24 }
  0x25   : > { %p726_p5 = pneg %p725_p1  ;;  %s729_s23 = scalar_lea.vmem %s728_s24, 128 }
  0x26   : > { %p730_p6 = scmp.lt.s32.totalorder %s208_s25, %s728_s24  ;;  %p731_p8 = scmp.lt.s32.totalorder %s729_s23, %s722_s11 }
  0x28   : > { %p732_p4 = por %p731_p8, %p730_p6 }
  0x2a   : > { %p733_p10 = pnand %p732_p4, %p726_p5 }
  0x2c   : > { %736 = shalt.err (!%p733_p10)
}
  0x2d   : > { %613 = dma.hbm_to_vmem [thread:$0]  (!%p1038_p12), %s205_s30, 64, %s208_s25, %s1042_s6  }
  0x2e   : > { %p1231_p13 = scmp.eq.s32.totalorder %s980_s21, 0  ;;  %p561_p0 = scmp.ge.s32.totalorder %s903_s20, 1 }
  0x2f   : > { %p167_p1 = scmp.lt.s32.totalorder %s903_s20, 3  ;;  %s906_s10 = smov [#allocation6]  }
  0x30   : > { %p1057_p6 = por %p1231_p13, %p52_p3  ;;  %s182_s28 = sshll.u32 %s906_s10, 4  ;;  %s183_s28 = int_to_ptr.vmem [resolvable:$true] %s182_s28 }
  0x31   : > { %p1061_p10 = pnand %p561_p0, %p167_p1  ;;  %s92_s30 = sand.u32 1, %s1003_s29  }
  0x32   : > { %s1245_s26 = scalar_select %p1057_p6, 1, 0 }
  0x33   : > { %s1246_s5 = scalar_select %p1061_p10, 1, 0 }
  0x34   : > { %p606_p5 = pneg %p1061_p10  ;;  %s748_s22 = scalar_lea.vmem %s183_s28, 128 }
  0x35   : > { %p749_p8 = scmp.ne.s32.totalorder %s183_s28, %s748_s22  ;;  %p756_p1 = scmp.lt.s32.totalorder %s183_s28, %s183_s28 }
  0x36   : > { %p1069_p12 = pnand %p606_p5, %p1231_p13  ;;  %p757_p11 = scmp.lt.s32.totalorder %s748_s22, %s748_s22 }
  0x38   : > { %p739_p3 = pneg %p1069_p12  ;;  %p758_p2 = por %p757_p11, %p756_p1 }
  0x3a   : > { %p751_p4 = pnand %p749_p8, %p739_p3 }
  0x3c   : > { %p752_p0 = pneg %p751_p4 }
  0x3e   : > { %p759_p9 = pnand %p758_p2, %p752_p0 }
  0x40   : > { %762 = shalt.err (!%p759_p9)
}
  0x41   : > { %s907_s11 = smov 64   ;;  %s908_s29 = smov 4  }
  0x42   : > { %s1248_s1 = sld [smem:[#allocation17_spill]]  ;;  %s117_s23 = sadd.s32 1, %s879_s14 }
  0x43   : > { %p557_p2 = scmp.lt.s32.totalorder %s92_s30, 0  ;;  %s99_s10 = sadd.s32 2, %s92_s30 }
  0x44   : > { %p560_p9 = scmp.lt.s32.totalorder %s1017_s8, 0  ;;  %s112_s22 = sadd.s32 2, %s1017_s8 }
  0x45   : > { %s1270_s10 = smov (!%p557_p2, %s99_s10), %s92_s30  ;;  %p124_p11 = scmp.ne.s32.totalorder %s879_s14, %s875_s13 }
  0x46   : > { %s1272_s22 = smov (!%p560_p9, %s112_s22), %s1017_s8  ;;  %p130_p5 = scmp.ne.s32.totalorder %s875_s13, %s871_s12 }
  0x47   : > { %s114_s0 = ssub.s32 %s1270_s10, %s1272_s22  ;;  %s216_s19 = sand.u32 1, %s879_s14  }
  0x48   : > { %609 = dma.hbm_to_vmem [thread:$0]  (!%p1069_p12), %s1248_s1, 128, %s183_s28, [#allocation7], %s907_s11, %s907_s11, %s908_s29  }
  0x49   : > { %p115_p3 = scmp.eq.s32.totalorder %s114_s0, 0  ;;  %p1249_p8 = scmp.eq.s32.totalorder %s903_s20, 0 }
  0x4a   : > { %p1094_p0 = por %p130_p5, %p1231_p13  ;;  %s566_s28 = sshll.u32 %s216_s19, 2 }
  0x4b   : > { %p126_p4 = por %p124_p11, %p1249_p8  ;;  %s570_s29 = sshll.u32 %s1270_s10, 6 }
  0x4c   : > { %s1250_s25 = scalar_select %p1094_p0, 1, 0 }
  0x4d   : > { %s1099_s11 = scalar_select %p115_p3, %s879_s14, %s117_s23  }
  0x4e   : > { %s1104_s8 = scalar_lea.hbm %s1225_s2, %s570_s29  ;;  %s218_s0 = scalar_lea.vmem [#allocation8], %s566_s28 }
  0x4f   : > { %s238_s12 = sshll.u32 %s218_s0, 4  ;;  %p1251_p12 = scmp.lt.s32.totalorder %s903_s20, 2  ;;  %s239_s12 = int_to_ptr.vmem [resolvable:$true] %s238_s12 }
  0x50   : > { %s763_s19 = scalar_lea.hbm %s1104_s8, 64  ;;  %s768_s22 = scalar_lea.hbm %s1225_s2, 128 }
  0x51   : > { %p1108_p1 = pnand %p1251_p12, %p126_p4  ;;  %p764_p2 = scmp.ne.s32.totalorder %s1104_s8, %s763_s19 }
  0x52   : > { %p769_p3 = scmp.lt.s32.totalorder %s1104_s8, %s1225_s2  ;;  %p770_p8 = scmp.lt.s32.totalorder %s768_s22, %s763_s19 }
  0x53   : > { %p765_p9 = pneg %p1108_p1 }
  0x54   : > { %p771_p4 = por %p770_p8, %p769_p3 }
  0x55   : > { %p766_p11 = pnand %p765_p9, %p764_p2 }
  0x57   : > { %p767_p5 = pneg %p766_p11 }
  0x59   : > { %p772_p12 = pnand %p771_p4, %p767_p5 }
  0x5b   : > { %775 = shalt.err (!%p772_p12)
}
  0x5c   : > { %s776_s27 = scalar_lea.vmem %s239_s12, 64  ;;  %s909_s30 = smov [#allocation8]  }
  0x5d   : > { %p777_p13 = scmp.ne.s32.totalorder %s239_s12, %s776_s27  ;;  %s781_s0 = sshll.u32 %s909_s30, 4  ;;  %s782_s0 = int_to_ptr.vmem [resolvable:$false] %s781_s0 }
  0x5e   : > { %s783_s1 = scalar_lea.vmem %s782_s0, 128  ;;  %p784_p2 = scmp.lt.s32.totalorder %s239_s12, %s782_s0 }
  0x5f   : > { %p779_p7 = pnand %p777_p13, %p765_p9  ;;  %p785_p11 = scmp.lt.s32.totalorder %s783_s1, %s776_s27 }
  0x61   : > { %p780_p0 = pneg %p779_p7  ;;  %p786_p6 = por %p785_p11, %p784_p2 }
  0x63   : > { %p787_p10 = pnand %p786_p6, %p780_p0 }
  0x65   : > { %790 = shalt.err (!%p787_p10)
}
  0x66   : > { %616 = dma.hbm_to_vmem [thread:$0]  (!%p1108_p1), %s1104_s8, 64, %s239_s12, %s1042_s6  }
  0x67   : > { %p1253_p5 = scmp.ne.s32.totalorder %s1246_s5, 0 }
  0x68   : > { %s249_s19 = sand.u32 (!%p1253_p5), 1, %s980_s21   ;;  %s1131_s23 = sand.u32 (!%p1253_p5), 1, %s887_s16  }
  0x69   : > { %247 = sbr.rel (%p1253_p5) target bundleno = 914 (0x392), region = 32  ;;  %s572_s10 = sshll.u32 (!%p1253_p5), %s1131_s23, 2 }
  0x6a   : > { %s250_s1 = scalar_lea.sflag (!%p1253_p5), [#allocation4], %s249_s19  ;;  %s253_s22 = scalar_lea.vmem (!%p1253_p5), [#allocation3], %s572_s10 }
  0x6b   : > { %p1254_p7 = scmp.ne.s32.totalorder (!%p1253_p5), %s1245_s26, 0 }
  0x6e   : > { %854 = dma.done.wait (%p1254_p7), %s250_s1, 64  }
  0x6f   : > { %856 = vsyncadd (%p1254_p7), %s250_s1, 4294967232  ;;  %p1255_p13 = scmp.eq.s32.totalorder %s980_s21, 0 }
  0x71   : > { %858 = dma.done.wait (%p1255_p13), [#allocation7], 128   ;;  %p1256_p6 = pmov %p1255_p13 }
  0x72   : > { %s264_s6 = sand.u32 1, %s875_s13   ;;  %p1257_p10 = scmp.ne.s32.totalorder %s1250_s25, 0 }
  0x73   : > { %860 = vsyncadd (%p1256_p6), [#allocation7], 4294967168  ;;  %s1143_s5 = sshll.u32 %s264_s6, 2 }
  0x74   : > { %s266_s8 = scalar_lea.vmem [#allocation8], %s1143_s5 }
  0x75   : > { %862 = dma.done.wait (%p1257_p10), %s250_s1, 64  }
  0x76   : > { %864 = vsyncadd (%p1257_p10), %s250_s1, 4294967232  ;;  %s575_s26 = sshll.u32 %s1131_s23, 3  ;;  %vm313_vm0 = vcmask 7168   ;;  %v910_v0 = vmov 0.0   ;;  %vm911_vm1 = vmmov 0   ;;  %vm323_vm2 = vcmask 261120  }
  0x77   : > { %314 = vst.msk [vmem:[#allocation2] sm:$0xff] %vm313_vm0, %v910_v0  ;;  %590 = vmatprep.subr.bf16.mxu0 %v910_v0  ;;  %592 = vmatprep.mubr.msk.bf16.mxu0 %vm911_vm1, %v910_v0  ;;  %v703_v1 = vld [vmem:[#allocation6] sm:$0xff]   ;;  %v315_v3 = vld [vmem:[%s253_s22] sm:$0xf]  ;;  %vm374_vm3 = vcmask 130048   ;;  %s579_s21 = sshll.u32 %s895_s18, 3 }
  0x78   : > { %v328_v2 = vsel %vm323_vm2, %v703_v1, 0  ;;  %s587_s25 = sadd.s32 8, %s579_s21  ;;  %p384_p0 = scmp.lt.s32.totalorder %s579_s21, 16 }
  0x79   : > { %591 = vmatpush3.bf16.xpose.msra.mxu0 %v328_v2  ;;  %p581_p1 = scmp.gt.s32.totalorder %s587_s25, 0  ;;  %s1159_s12 = scalar_lea.vmem [#allocation9], %s575_s26 }
  0x7b   : > { %p389_p9 = pnand %p581_p1, %p384_p0 }
  0x7e   : > { %v373_v12 = vld [vmem:[#allocation2] sm:$0xff] }
  0x80   : > { %593 = vmatmul.mubr.msk.bf16.vlgmr.msra.gmra.mxu0 %vm323_vm2, %v315_v3 }
 0x140   : > { %v364_v4 = vpop.f32.mrf.mxu0 }
 0x141   : > { %v578_v5 = vadd.f32 -2.0, %v364_v4 }
 0x142   : > { %v594_v6 = vpop.f32.mrf.mxu0 }
 0x143   : > { %v371_v7 = vmul.f32 1.442695, %v578_v5 }
 0x144   : > { %v367_v8 = vpop.f32.mrf.mxu0 }
 0x145   : > { %704 = vpow2.f32 %v371_v7 }
 0x146   : > { %v595_v9 = vpop.f32.mrf.mxu0 }
 0x152   : > { %v705_v10 = vpop.eup %704 }
 0x153   : > { %v375_v11 = vsel %vm374_vm3, %v705_v10, 0.0 }
 0x154   : > { %376 = vadd.xlane.f32.xlu0 %v375_v11 }
 0x1dc   : > { %392 = sbr.rel (%p389_p9) target bundleno = 631 (0x277), region = 52 }
 0x1dd   : > { %v377_v13 = vpop.xlane.xlu0 %376 }
 0x1de   : > { %v378_v14 = vadd.f32 %v377_v13, %v373_v12 }
 0x1e0   : > { %380 = vst.msk [vmem:[#allocation2] sm:$0xff] %vm313_vm0, %v378_v14 }
 0x1e1   : > { %v393_v15 = vlaneseq  ;;  %v395_v16 = vstv %s579_s21 }
 0x1e3   : > { %v394_v17 = vshrl.u32 %v393_v15, 7  ;;  %v398_v18 = vand.u32 127, %v393_v15 }
 0x1e5   : > { %v396_v19 = vadd.s32 %v395_v16, %v394_v17 }
 0x1e7   : > { %vm401_vm4 = vcmp.eq.s32.totalorder %v396_v19, %v398_v18 }
 0x1e8   : > { %v402_v20 = vsel %vm401_vm4, %v705_v10, 0.0 }
 0x1e9   : > { %v403_v21 = vsel %vm374_vm3, %v402_v20, 0.0 }
 0x1ea   : > { %404 = vadd.xlane.f32.xlu0 %v403_v21 }
 0x273   : > { %v405_v22 = vpop.xlane.xlu0 %404 }
 0x274   : > { %v406_v23 = vsub.f32 %v378_v14, %v405_v22 }
 0x276   : > { %407 = vst.msk [vmem:[#allocation2] sm:$0xff] %vm313_vm0, %v406_v23 }
 0x277 PF: > { %v415_v24 = vunpack.c.l.bf16 %v315_v3  ;;  %v416_v25 = vld [vmem:[%s266_s8] sm:$0xf]  ;;  %v912_v29 = vmov 0   ;;  %s583_s24 = sshll.u32 %s895_s18, 7  ;;  %s443_s29 = sshll.u32 %s1159_s12, 4  ;;  %s444_s29 = int_to_ptr.vmem [resolvable:$true] %s443_s29 }
 0x278   : > { %v417_v26 = vunpack.c.l.bf16 %v416_v25  ;;  %706 = vset.pattern.permute.xlu0 %v912_v29  ;;  %s1171_s30 = scalar_lea.hbm %s1226_s3, %s583_s24  ;;  %s430_s0 = scalar_lea.sflag [#allocation5], %s1131_s23 }
 0x279   : > { %s791_s19 = scalar_lea.vmem %s444_s29, 128  ;;  %p1258_p8 = scmp.ne.s32.totalorder %s1241_s7, 0 }
 0x27a   : > { %v418_v27 = vmul.f32 %v417_v26, %v415_v24  ;;  %p792_p3 = scmp.ne.s32.totalorder %s444_s29, %s791_s19  ;;  %s913_s10 = smov [#allocation9]  }
 0x27b   : > { %s795_s1 = sshll.u32 %s913_s10, 4  ;;  %s796_s1 = int_to_ptr.vmem [resolvable:$false] %s795_s1 }
 0x27c   : > { %v419_v28 = vsel %vm323_vm2, %v418_v27, 0.0  ;;  %p793_p4 = pnand %p792_p3, %p1258_p8  ;;  %s797_s22 = scalar_lea.vmem %s796_s1, 256 }
 0x27d   : > { %420 = vadd.xlane.f32.xlu0 %v419_v28  ;;  %v411_v30 = vld [vmem:[#allocation2] sm:$0xff]  ;;  %p798_p2 = scmp.lt.s32.totalorder %s444_s29, %s796_s1  ;;  %p799_p11 = scmp.lt.s32.totalorder %s797_s22, %s791_s19 }
 0x27e   : > { %707 = vlog2.f32 %v411_v30  ;;  %p794_p12 = pneg %p793_p4 }
 0x27f   : > { %p800_p5 = por %p799_p11, %p798_p2 }
 0x281   : > { %p801_p7 = pnand %p800_p5, %p794_p12 }
 0x28b   : > { %v708_v31 = vpop.eup %707 }
 0x28c   : > { %v413_v32 = vmul.f32 0.6931472, %v708_v31 }
 0x28e   : > { %v414_v33 = vadd.f32 2.0, %v413_v32 }
 0x306   : > { %v421_v34 = vpop.xlane.xlu0 %420 }
 0x307   : > { %v422_v35 = vsub.f32 %v414_v33, %v421_v34 }
 0x309   : > { %425 = vperm.xlu0 %706, %v422_v35  }
 0x384   : > { %v426_v36 = vpop.permute.xlu0 %425 }
 0x385   : > { %428 = vst [vmem:[%s1159_s12] sm:$0xff] %v426_v36 }
 0x386   : > { %804 = shalt.err (!%p801_p7)
}
 0x387   : > { %s805_s18 = scalar_lea.hbm %s1171_s30, 128  ;;  %s809_s5 = scalar_lea.hbm %s1226_s3, 256 }
 0x388   : > { %p806_p13 = scmp.ne.s32.totalorder %s1171_s30, %s805_s18  ;;  %p810_p0 = scmp.lt.s32.totalorder %s1171_s30, %s1226_s3 }
 0x389   : > { %p811_p1 = scmp.lt.s32.totalorder %s809_s5, %s805_s18 }
 0x38a   : > { %p807_p6 = pnand %p806_p13, %p1258_p8 }
 0x38b   : > { %p812_p9 = por %p811_p1, %p810_p0 }
 0x38c   : > { %p808_p10 = pneg %p807_p6 }
 0x38e   : > { %p813_p3 = pnand %p812_p9, %p808_p10 }
 0x390   : > { %816 = shalt.err (!%p813_p3)
}
 0x391   : > { %604 = dma.vmem_to_hbm [thread:$0]  (%p1258_p8), %s444_s29, 128, %s1171_s30, %s430_s0  }
 0x392 PF: > { %s455_s21 = sand.u32 1, %s883_s15   ;;  %p1259_p4 = scmp.ne.s32.totalorder %s1242_s9, 0 }
 0x393   : > { %p1260_p12 = scmp.ge.s32.totalorder %s903_s20, 2  ;;  %s456_s25 = scalar_lea.sflag [#allocation5], %s455_s21 }
 0x395   : > { %p618_p2 = pnand %p1260_p12, %p1259_p4 }
 0x397   : > { %p619_p11 = pneg %p618_p2 }
 0x399   : > { %866 = dma.done.wait (%p619_p11), %s456_s25, 128  }
 0x39a   : > { %868 = vsyncadd (%p619_p11), %s456_s25, 4294967168  ;;  %s20_s20 = sadd.s32 1, %s903_s20   ;;  %s1261_s18 = sld [smem:[#allocation14_spill]] }
 0x39b   : > { %p17_p5 = scmp.ge.s32.totalorder %s20_s20, 4   ;;  %s1262_s19 = sld [smem:[#allocation15_spill]] }
 0x39c   : > { %s1263_s12 = smov %s875_s13  ;;  %s1264_s13 = smov %s879_s14 }
 0x39d   : > { %s1265_s14 = smov %s1099_s11  ;;  %s1266_s15 = smov %s887_s16 }
 0x39e   : > { %s1267_s16 = smov %s891_s17  ;;  %s1268_s17 = smov %s1008_s4 }
 0x39f   :  { %19 = sbr.rel (!%p17_p5) target bundleno = 12 (0xc), region = 105 }
 0x3a4   :  { %461 = vsyncpa [#allocation4], 1 }
 0x3a5   :  { %463 = vsyncpa [#allocation4 + $0x1], 1 }
 0x3a6   :  { %464 = vsyncpa [#allocation7], 1 }
 0x3a7   :  { %465 = vsyncpa [#allocation5], 1 }
 0x3a8   :  { %467 = vsyncpa [#allocation5 + $0x1], 1 }

</bundles_post_ra>
